<compile_context>
chip_gen: v7x
topology: tpu7x:2x2x1
jax: 0.10.0
libtpu: 0.0.40
codegen_flags: <defaults>
</compile_context>

<pallas_src>
import jax
import jax.numpy as jnp
from jax.experimental import pallas as pl
from jax.experimental.pallas import tpu as pltpu

SIZE = 32                                  # `size` arg of Net.__init__
DIMS = [SIZE, 120, 240, 120, 40, 1]        # fc1..fc5 (real PyTorch shapes)
N_LAYERS = len(DIMS) - 1                   # 5

# ---- lane-aligned padded layout -------------------------------------------------
P_IN = 128                                 # padded input features (32 -> 128)
P_H = 256                                  # uniform padded hidden / output width
P_OUT = 128                                # padded width of kernel output block
PAD_KIN = (P_IN,) + (P_H,) * (N_LAYERS - 1)                 # (128, 256, 256, 256, 256)
ROW_OFF = tuple(int(sum(PAD_KIN[:i])) for i in range(N_LAYERS))   # (0,128,384,640,896)
TOTAL_ROWS = int(sum(PAD_KIN))                               # 1152


def _round_up(x, m):
    return (x + m - 1) // m * m


# ---- kernel ---------------------------------------------------------------------
def _mlp_kernel(x_ref, w_ref, b_ref, o_ref):
    """Whole MLP fused: 5 MXU matmuls, ReLU on VPU, exp/recip on EUP."""
    h = x_ref[...]                                           # (TB, 128) f32
    for i in range(N_LAYERS):                                # static unroll (5 layers)
        r0, kin = ROW_OFF[i], PAD_KIN[i]
        w = w_ref[r0:r0 + kin, :]                            # (kin, 256) bf16, tile-aligned
        b = b_ref[:, i * P_H:(i + 1) * P_H]                  # (1, 256) f32
        z = jnp.dot(h.astype(jnp.bfloat16), w,
                    preferred_element_type=jnp.float32) + b  # f32 accumulate
        h = jnp.maximum(z, 0.0) if i < N_LAYERS - 1 else z
    # sigmoid(z) = 1 / (1 + exp(-z)); exp + approximate reciprocal both on EUP.
    sig = pl.reciprocal(1.0 + jnp.exp(-h), approx=True)      # (TB, 256)
    o_ref[...] = sig[:, :P_OUT].astype(o_ref.dtype)          # lane-dense (TB, 128) store


# ---- wrapper --------------------------------------------------------------------
@jax.jit
def net_forward(x, w_blob, b_blob):
    """x: (B, SIZE) f32; w_blob: (1152, 256) bf16; b_blob: (1, 1280) f32 -> (B, 1)."""
    B, F = x.shape
    TB = 128 if B >= 128 else _round_up(max(B, 1), 8)        # batch tile
    B_pad = _round_up(B, TB)
    x_pad = jnp.zeros((B_pad, P_IN), jnp.float32).at[:B, :F].set(x.astype(jnp.float32))

    out = pl.pallas_call(
        _mlp_kernel,
        out_shape=jax.ShapeDtypeStruct((B_pad, P_OUT), jnp.float32),
        grid_spec=pltpu.PrefetchScalarGridSpec(
            num_scalar_prefetch=0,
            grid=(B_pad // TB,),
            in_specs=[
                pl.BlockSpec((TB, P_IN), lambda i: (i, 0)),            # x, batch-tiled
                pl.BlockSpec((TOTAL_ROWS, P_H), lambda i: (0, 0)),     # packed weights (1 DMA)
                pl.BlockSpec((1, N_LAYERS * P_H), lambda i: (0, 0)),   # packed biases  (1 DMA)
            ],
            out_specs=pl.BlockSpec((TB, P_OUT), lambda i: (i, 0)),
        ),
        compiler_params=pltpu.CompilerParams(
            dimension_semantics=("parallel",)),                        # shards batch on v7x TCs
    )(x_pad, w_blob, b_blob)
    return out[:B, :1]


# ---- parameter construction / packing --------------------------------------------
def init_params(key):
    """PyTorch nn.Linear default init (uniform +-1/sqrt(fan_in)); W: (in,out), b: (1,out)."""
    params = []
    for i in range(N_LAYERS):
        fan_in, fan_out = DIMS[i], DIMS[i + 1]
        key, kw, kb = jax.random.split(key, 3)
        bound = 1.0 / jnp.sqrt(jnp.float32(fan_in))
        w = jax.random.uniform(kw, (fan_in, fan_out), jnp.float32, -bound, bound)
        b = jax.random.uniform(kb, (1, fan_out), jnp.float32, -bound, bound)
        params.append((w, b))
    return params


def pack_params(params):
    """Pack all layers into one bf16 weight blob + one f32 bias blob (padding = 0)."""
    w_blob = jnp.zeros((TOTAL_ROWS, P_H), jnp.float32)
    b_blob = jnp.zeros((1, N_LAYERS * P_H), jnp.float32)
    for i, (w, b) in enumerate(params):
        kin, nout = w.shape
        r0 = ROW_OFF[i]
        w_blob = w_blob.at[r0:r0 + kin, :nout].set(w)
        b_blob = b_blob.at[:, i * P_H:i * P_H + nout].set(b.reshape(1, nout))
    return w_blob.astype(jnp.bfloat16), b_blob


# ---- references -------------------------------------------------------------------
def reference_forward(x, params):
    """Pure f32 reference (exact PyTorch semantics)."""
    h = x
    for i, (w, b) in enumerate(params):
        h = h @ w + b
        if i < len(params) - 1:
            h = jnp.maximum(h, 0.0)
    return jax.nn.sigmoid(h)


def reference_forward_bf16(x, params):
    """Reference emulating the kernel's bf16 weight/activation rounding (biases f32)."""
    h = x
    for i, (w, b) in enumerate(params):
        h_q = h.astype(jnp.bfloat16).astype(jnp.float32)
        w_q = w.astype(jnp.bfloat16).astype(jnp.float32)
        h = h_q @ w_q + b
        if i < len(params) - 1:
            h = jnp.maximum(h, 0.0)
    return jax.nn.sigmoid(h)


if __name__ == "__main__":
    key = jax.random.PRNGKey(0)
    key, kx_small, kx_big = jax.random.split(key, 3)
    params = init_params(key)
    w_blob, b_blob = pack_params(params)

    # Small batch (original shape) and a batched case that exercises the parallel grid.
    for batch, kx in ((8, kx_small), (256, kx_big)):
        x = jax.random.normal(kx, (batch, SIZE), jnp.float32)
        out = jax.block_until_ready(net_forward(x, w_blob, b_blob))
        assert out.shape == (batch, 1)

        ref_q = reference_forward_bf16(x, params)   # same bf16 rounding as kernel
        ref_f = reference_forward(x, params)        # exact f32 PyTorch semantics
        assert float(jnp.max(jnp.abs(out - ref_q))) < 1e-2   # approx-recip + sum-order slack
        assert float(jnp.max(jnp.abs(out - ref_f))) < 3e-2   # bf16-weight sanity bound

    print("KERNEL_OK")
</pallas_src>

<mosaic_0001>
module attributes {stable_mosaic.version = 11 : i64} {
  func.func @_mlp_kernel(%arg0: i32, %arg1: memref<8x128xf32, #tpu.memory_space<vmem>>, %arg2: memref<1152x256xbf16, #tpu.memory_space<vmem>>, %arg3: memref<1x1280xf32, #tpu.memory_space<vmem>>, %arg4: memref<8x128xf32, #tpu.memory_space<vmem>>) attributes {dimension_semantics = [#tpu.dimension_semantics<parallel>], iteration_bounds = array<i64: 1>, scalar_prefetch = 0 : i64, scratch_operands = 0 : i64, tpu.core_type = #tpu.core_type<tc>, window_params = [{transform_indices = @transform_0, window_bounds = array<i64: 8, 128>}, {pipeline_mode = #tpu.pipeline_mode<synchronous>, transform_indices = @transform_1, window_bounds = array<i64: 1152, 256>}, {pipeline_mode = #tpu.pipeline_mode<synchronous>, transform_indices = @transform_2, window_bounds = array<i64: 1, 1280>}, {transform_indices = @transform_3, window_bounds = array<i64: 8, 128>}]} {
    %c0 = arith.constant 0 : index
    %c0_0 = arith.constant 0 : index
    %0 = vector.load %arg1[%c0, %c0_0] : memref<8x128xf32, #tpu.memory_space<vmem>>, vector<8x128xf32>
    %c0_1 = arith.constant 0 : index
    %c0_2 = arith.constant 0 : index
    %1 = vector.load %arg2[%c0_1, %c0_2] : memref<1152x256xbf16, #tpu.memory_space<vmem>>, vector<128x256xbf16>
    %c0_3 = arith.constant 0 : index
    %c0_4 = arith.constant 0 : index
    %2 = vector.load %arg3[%c0_3, %c0_4] : memref<1x1280xf32, #tpu.memory_space<vmem>>, vector<1x256xf32>
    %3 = arith.truncf %0 : vector<8x128xf32> to vector<8x128xbf16>
    %cst = arith.constant dense<0.000000e+00> : vector<8x256xf32>
    %4 = tpu.matmul %3, %1, %cst {dimension_numbers = #tpu.dot_dimension_numbers<[1], [0], [0], [1], [0, 0, 1, 1], [], []>} : vector<8x128xbf16>, vector<128x256xbf16>, vector<8x256xf32> -> vector<8x256xf32>
    %5 = vector.broadcast %2 : vector<1x256xf32> to vector<8x256xf32>
    %6 = arith.addf %4, %5 : vector<8x256xf32>
    %cst_5 = arith.constant 0.000000e+00 : f32
    %7 = vector.broadcast %cst_5 : f32 to vector<8x256xf32>
    %8 = arith.maximumf %6, %7 : vector<8x256xf32>
    %c128 = arith.constant 128 : index
    %c0_6 = arith.constant 0 : index
    %9 = vector.load %arg2[%c128, %c0_6] : memref<1152x256xbf16, #tpu.memory_space<vmem>>, vector<256x256xbf16>
    %c0_7 = arith.constant 0 : index
    %c256 = arith.constant 256 : index
    %10 = vector.load %arg3[%c0_7, %c256] : memref<1x1280xf32, #tpu.memory_space<vmem>>, vector<1x256xf32>
    %11 = arith.truncf %8 : vector<8x256xf32> to vector<8x256xbf16>
    %cst_8 = arith.constant dense<0.000000e+00> : vector<8x256xf32>
    %12 = tpu.matmul %11, %9, %cst_8 {dimension_numbers = #tpu.dot_dimension_numbers<[1], [0], [0], [1], [0, 0, 1, 1], [], []>} : vector<8x256xbf16>, vector<256x256xbf16>, vector<8x256xf32> -> vector<8x256xf32>
    %13 = vector.broadcast %10 : vector<1x256xf32> to vector<8x256xf32>
    %14 = arith.addf %12, %13 : vector<8x256xf32>
    %cst_9 = arith.constant 0.000000e+00 : f32
    %15 = vector.broadcast %cst_9 : f32 to vector<8x256xf32>
    %16 = arith.maximumf %14, %15 : vector<8x256xf32>
    %c384 = arith.constant 384 : index
    %c0_10 = arith.constant 0 : index
    %17 = vector.load %arg2[%c384, %c0_10] : memref<1152x256xbf16, #tpu.memory_space<vmem>>, vector<256x256xbf16>
    %c0_11 = arith.constant 0 : index
    %c512 = arith.constant 512 : index
    %18 = vector.load %arg3[%c0_11, %c512] : memref<1x1280xf32, #tpu.memory_space<vmem>>, vector<1x256xf32>
    %19 = arith.truncf %16 : vector<8x256xf32> to vector<8x256xbf16>
    %cst_12 = arith.constant dense<0.000000e+00> : vector<8x256xf32>
    %20 = tpu.matmul %19, %17, %cst_12 {dimension_numbers = #tpu.dot_dimension_numbers<[1], [0], [0], [1], [0, 0, 1, 1], [], []>} : vector<8x256xbf16>, vector<256x256xbf16>, vector<8x256xf32> -> vector<8x256xf32>
    %21 = vector.broadcast %18 : vector<1x256xf32> to vector<8x256xf32>
    %22 = arith.addf %20, %21 : vector<8x256xf32>
    %cst_13 = arith.constant 0.000000e+00 : f32
    %23 = vector.broadcast %cst_13 : f32 to vector<8x256xf32>
    %24 = arith.maximumf %22, %23 : vector<8x256xf32>
    %c640 = arith.constant 640 : index
    %c0_14 = arith.constant 0 : index
    %25 = vector.load %arg2[%c640, %c0_14] : memref<1152x256xbf16, #tpu.memory_space<vmem>>, vector<256x256xbf16>
    %c0_15 = arith.constant 0 : index
    %c768 = arith.constant 768 : index
    %26 = vector.load %arg3[%c0_15, %c768] : memref<1x1280xf32, #tpu.memory_space<vmem>>, vector<1x256xf32>
    %27 = arith.truncf %24 : vector<8x256xf32> to vector<8x256xbf16>
    %cst_16 = arith.constant dense<0.000000e+00> : vector<8x256xf32>
    %28 = tpu.matmul %27, %25, %cst_16 {dimension_numbers = #tpu.dot_dimension_numbers<[1], [0], [0], [1], [0, 0, 1, 1], [], []>} : vector<8x256xbf16>, vector<256x256xbf16>, vector<8x256xf32> -> vector<8x256xf32>
    %29 = vector.broadcast %26 : vector<1x256xf32> to vector<8x256xf32>
    %30 = arith.addf %28, %29 : vector<8x256xf32>
    %cst_17 = arith.constant 0.000000e+00 : f32
    %31 = vector.broadcast %cst_17 : f32 to vector<8x256xf32>
    %32 = arith.maximumf %30, %31 : vector<8x256xf32>
    %c896 = arith.constant 896 : index
    %c0_18 = arith.constant 0 : index
    %33 = vector.load %arg2[%c896, %c0_18] : memref<1152x256xbf16, #tpu.memory_space<vmem>>, vector<256x256xbf16>
    %c0_19 = arith.constant 0 : index
    %c1024 = arith.constant 1024 : index
    %34 = vector.load %arg3[%c0_19, %c1024] : memref<1x1280xf32, #tpu.memory_space<vmem>>, vector<1x256xf32>
    %35 = arith.truncf %32 : vector<8x256xf32> to vector<8x256xbf16>
    %cst_20 = arith.constant dense<0.000000e+00> : vector<8x256xf32>
    %36 = tpu.matmul %35, %33, %cst_20 {dimension_numbers = #tpu.dot_dimension_numbers<[1], [0], [0], [1], [0, 0, 1, 1], [], []>} : vector<8x256xbf16>, vector<256x256xbf16>, vector<8x256xf32> -> vector<8x256xf32>
    %37 = vector.broadcast %34 : vector<1x256xf32> to vector<8x256xf32>
    %38 = arith.addf %36, %37 : vector<8x256xf32>
    %cst_21 = arith.constant 0.000000e+00 : f32
    %39 = vector.broadcast %cst_21 : f32 to vector<8x256xf32>
    %40 = arith.subf %39, %38 : vector<8x256xf32>
    %41 = math.exp %40 : vector<8x256xf32>
    %cst_22 = arith.constant 1.000000e+00 : f32
    %42 = vector.broadcast %cst_22 : f32 to vector<8x256xf32>
    %43 = arith.addf %42, %41 : vector<8x256xf32>
    %44 = tpu.reciprocal %43 {approx = true} : vector<8x256xf32> -> vector<8x256xf32>
    %45 = vector.extract_strided_slice %44 {offsets = [0, 0], sizes = [8, 128], strides = [1, 1]} : vector<8x256xf32> to vector<8x128xf32>
    %c0_23 = arith.constant 0 : index
    %c0_24 = arith.constant 0 : index
    %46 = vector.load %arg4[%c0_23, %c0_24] : memref<8x128xf32, #tpu.memory_space<vmem>>, vector<8x128xf32>
    tpu.vector_store %arg4[%c0_23, %c0_24], %45 {strides = array<i32>} : memref<8x128xf32, #tpu.memory_space<vmem>>, vector<8x128xf32>,
    return
  }
  func.func @transform_0(%arg0: i32) -> (i32, i32) {
    %c0_i32 = arith.constant 0 : i32
    %c0_i32_0 = arith.constant 0 : i32
    return %arg0, %c0_i32 : i32, i32
  }
  func.func @transform_1(%arg0: i32) -> (i32, i32) {
    %c0_i32 = arith.constant 0 : i32
    %c0_i32_0 = arith.constant 0 : i32
    %c0_i32_1 = arith.constant 0 : i32
    return %c0_i32, %c0_i32_0 : i32, i32
  }
  func.func @transform_2(%arg0: i32) -> (i32, i32) {
    %c0_i32 = arith.constant 0 : i32
    %c0_i32_0 = arith.constant 0 : i32
    %c0_i32_1 = arith.constant 0 : i32
    return %c0_i32, %c0_i32_0 : i32, i32
  }
  func.func @transform_3(%arg0: i32) -> (i32, i32) {
    %c0_i32 = arith.constant 0 : i32
    %c0_i32_0 = arith.constant 0 : i32
    return %arg0, %c0_i32 : i32, i32
  }
}

</mosaic_0001>

<bundles_post_ra>
// kernel: net_forward.1
= control target key start
LH: loop header
LB: loop body
LE: loop exit
PB: predicated region body
PF: predicated region fallthrough
CT: control target
= control target key end

     0   :  { %8 = vsyncpa [#allocation3], 0  ;;  %s1573_s12 = smov [#allocation2]   ;;  %s1643_s0 = inlined_call_operand.vmem [shape: f32[8,128], index: 0, kind: input, shape index: {}]   ;;  %s1644_s1 = inlined_call_operand.hbm [shape: bf16[1152,256], index: 1, kind: input, shape index: {}]   ;;  %s1645_s2 = inlined_call_operand.vmem [shape: f32[1,1280], index: 2, kind: input, shape index: {}]   ;;  %s1646_s3 = inlined_call_operand.vmem [shape: f32[8,128], index: 3, kind: output, shape index: {}]  }
   0x1   :  { %s16_s13 = sshll.u32 %s1573_s12, 4  ;;  %s1549_s16 = scalar_lea.hbm %s1644_s1, 18432  ;;  %s17_s13 = int_to_ptr.vmem [resolvable:$true] %s16_s13 }
   0x2   :  { %p1550_p0 = scmp.ne.s32.totalorder %s1644_s1, %s1549_s16  ;;  %p1553_p1 = scmp.lt.u32.totalorder %s1549_s16, %s1644_s1 }
   0x4   :  { %p1555_p2 = pnand %p1553_p1, %p1550_p0 }
   0x6   :  { %1558 = shalt.err (!%p1555_p2)
}
   0x7   :  { %s1559_s21 = scalar_lea.vmem %s17_s13, 18432  ;;  %p1564_p4 = scmp.lt.s32.totalorder %s17_s13, %s17_s13 }
   0x8   :  { %p1560_p3 = scmp.ne.s32.totalorder %s17_s13, %s1559_s21  ;;  %p1565_p5 = scmp.lt.s32.totalorder %s1559_s21, %s1559_s21 }
   0xa   :  { %p1566_p6 = por %p1565_p5, %p1564_p4 }
   0xc   :  { %p1567_p7 = pnand %p1566_p6, %p1560_p3 }
   0xe   :  { %1570 = shalt.err (!%p1567_p7)
}
   0xf   :  { %s1574_s22 = smov 128   ;;  %s1575_s23 = smov 8  }
  0x10   :  { %22 = dma.hbm_to_vmem [thread:$0]  %s1644_s1, 18432, %s17_s13, [#allocation3], %s1574_s22, %s1574_s22, %s1575_s23  }
  0x11   :  { %1571 = dma.done.wait [#allocation3], 18432  }
  0x12   :  { %1572 = vsyncadd [#allocation3], 4294948864  ;;  %v1576_v0 = vmov 0   ;;  %v1329_v1 = vld [vmem:[#allocation2 + $0x4] ss:$8 sps:$4 sm:$0xff]  }
  0x13   :  { %171 = vmatprep.mubr.bf16.mxu0 %v1576_v0  ;;  %v1331_v2 = vld [vmem:[#allocation2] ss:$8 sps:$4 sm:$0xff]   ;;  %139 = vmatprep.subr.bf16.mxu0 %v1329_v1  ;;  %v1332_v3 = vld [vmem:[#allocation2 + $0x14] ss:$8 sps:$4 sm:$0xff]   ;;  %v1334_v4 = vld [vmem:[#allocation2 + $0x10] ss:$8 sps:$4 sm:$0xff]  }
  0x14   :  { %140 = vmatpush1.bf16.msra.mxu0 %v1331_v2  ;;  %v1335_v5 = vld [vmem:[#allocation2 + $0x24] ss:$8 sps:$4 sm:$0xff]   ;;  %v1337_v6 = vld [vmem:[#allocation2 + $0x20] ss:$8 sps:$4 sm:$0xff]   ;;  %v1338_v7 = vld [vmem:[#allocation2 + $0x34] ss:$8 sps:$4 sm:$0xff]  }
  0x15   :  { %141 = vmatprep.subr.bf16.mxu0 %v1332_v3  ;;  %v1340_v8 = vld [vmem:[#allocation2 + $0x30] ss:$8 sps:$4 sm:$0xff]   ;;  %v1341_v9 = vld [vmem:[#allocation2 + $0x44] ss:$8 sps:$4 sm:$0xff]   ;;  %v1355_v11 = vld [vmem:[#allocation2 + $0x80] ss:$8 sps:$4 sm:$0xff]  }
  0x16   :  { %v1353_v10 = vld [vmem:[#allocation2 + $0x84] ss:$8 sps:$4 sm:$0xff]   ;;  %v1356_v12 = vld [vmem:[#allocation2 + $0x94] ss:$8 sps:$4 sm:$0xff]   ;;  %v1343_v13 = vld [vmem:[#allocation2 + $0x40] ss:$8 sps:$4 sm:$0xff]  }
  0x17   :  { %388 = vmatprep.subr.bf16.mxu1 %v1353_v10  ;;  %v1358_v14 = vld [vmem:[#allocation2 + $0x90] ss:$8 sps:$4 sm:$0xff]   ;;  %v1359_v15 = vld [vmem:[#allocation2 + $0xa4] ss:$8 sps:$4 sm:$0xff]   ;;  %v1344_v16 = vld [vmem:[#allocation2 + $0x54] ss:$8 sps:$4 sm:$0xff]  }
  0x18   :  { %142 = vmatpush1.bf16.msra.mxu0 %v1334_v4  ;;  %389 = vmatpush1.bf16.msra.mxu1 %v1355_v11  ;;  %v1346_v17 = vld [vmem:[#allocation2 + $0x50] ss:$8 sps:$4 sm:$0xff]   ;;  %v1361_v18 = vld [vmem:[#allocation2 + $0xa0] ss:$8 sps:$4 sm:$0xff]   ;;  %v1362_v19 = vld [vmem:[#allocation2 + $0xb4] ss:$8 sps:$4 sm:$0xff]  }
  0x19   :  { %143 = vmatprep.subr.bf16.mxu0 %v1335_v5  ;;  %390 = vmatprep.subr.bf16.mxu1 %v1356_v12  ;;  %v1347_v20 = vld [vmem:[#allocation2 + $0x64] ss:$8 sps:$4 sm:$0xff]   ;;  %v1349_v21 = vld [vmem:[#allocation2 + $0x60] ss:$8 sps:$4 sm:$0xff]   ;;  %v1364_v22 = vld [vmem:[#allocation2 + $0xb0] ss:$8 sps:$4 sm:$0xff]  }
  0x1a   :  { %v1365_v23 = vld [vmem:[#allocation2 + $0xc4] ss:$8 sps:$4 sm:$0xff]   ;;  %v1350_v24 = vld [vmem:[#allocation2 + $0x74] ss:$8 sps:$4 sm:$0xff]   ;;  %v1352_v25 = vld [vmem:[#allocation2 + $0x70] ss:$8 sps:$4 sm:$0xff]  }
  0x1b   :  { %v29_v26 = vld [vmem:[%s1643_s0] sm:$0xff]  ;;  %v1368_v28 = vld [vmem:[#allocation2 + $0xd4] ss:$8 sps:$4 sm:$0xff]   ;;  %v1370_v29 = vld [vmem:[#allocation2 + $0xd0] ss:$8 sps:$4 sm:$0xff]  }
  0x1c   :  { %144 = vmatpush1.bf16.msra.mxu0 %v1337_v6  ;;  %391 = vmatpush1.bf16.msra.mxu1 %v1358_v14  ;;  %v1367_v27 = vld [vmem:[#allocation2 + $0xc0] ss:$8 sps:$4 sm:$0xff]   ;;  %v1371_v30 = vld [vmem:[#allocation2 + $0xe4] ss:$8 sps:$4 sm:$0xff]   ;;  %v47_v31 = vpack.c.bf16 %v29_v26, %v29_v26  ;;  %v1374_v33 = vld [vmem:[#allocation2 + $0xf4] ss:$8 sps:$4 sm:$0xff]  }
  0x1d   :  { %145 = vmatprep.subr.bf16.mxu0 %v1338_v7  ;;  %392 = vmatprep.subr.bf16.mxu1 %v1359_v15  ;;  %v1373_v32 = vld [vmem:[#allocation2 + $0xe0] ss:$8 sps:$4 sm:$0xff]   ;;  %v1376_v34 = vld [vmem:[#allocation2 + $0xf0] ss:$8 sps:$4 sm:$0xff]   ;;  %v1377_v35 = vld [vmem:[#allocation2 + $0x104] ss:$8 sps:$4 sm:$0xff]   ;;  %v49_v15 = vlaneseq }
  0x1e   :  { %v1379_v36 = vld [vmem:[#allocation2 + $0x100] ss:$8 sps:$4 sm:$0xff]   ;;  %v1380_v37 = vld [vmem:[#allocation2 + $0x114] ss:$8 sps:$4 sm:$0xff]   ;;  %v1382_v38 = vld [vmem:[#allocation2 + $0x110] ss:$8 sps:$4 sm:$0xff]  }
  0x1f   :  { %v1383_v39 = vld [vmem:[#allocation2 + $0x124] ss:$8 sps:$4 sm:$0xff]   ;;  %v1385_v40 = vld [vmem:[#allocation2 + $0x120] ss:$8 sps:$4 sm:$0xff]   ;;  %v1386_v41 = vld [vmem:[#allocation2 + $0x134] ss:$8 sps:$4 sm:$0xff]  }
  0x20   :  { %146 = vmatpush1.bf16.msra.mxu0 %v1340_v8  ;;  %393 = vmatpush1.bf16.msra.mxu1 %v1361_v18  ;;  %v1388_v42 = vld [vmem:[#allocation2 + $0x130] ss:$8 sps:$4 sm:$0xff]   ;;  %v1389_v43 = vld [vmem:[#allocation2 + $0x144] ss:$8 sps:$4 sm:$0xff]   ;;  %v1391_v44 = vld [vmem:[#allocation2 + $0x140] ss:$8 sps:$4 sm:$0xff]  }
  0x21   :  { %147 = vmatprep.subr.bf16.mxu0 %v1341_v9  ;;  %394 = vmatprep.subr.bf16.mxu1 %v1362_v19  ;;  %v1392_v45 = vld [vmem:[#allocation2 + $0x154] ss:$8 sps:$4 sm:$0xff]   ;;  %v1394_v46 = vld [vmem:[#allocation2 + $0x150] ss:$8 sps:$4 sm:$0xff]   ;;  %v1395_v47 = vld [vmem:[#allocation2 + $0x164] ss:$8 sps:$4 sm:$0xff]  }
  0x22   :  { %v1397_v48 = vld [vmem:[#allocation2 + $0x160] ss:$8 sps:$4 sm:$0xff]   ;;  %v1398_v49 = vld [vmem:[#allocation2 + $0x174] ss:$8 sps:$4 sm:$0xff]   ;;  %v1400_v50 = vld [vmem:[#allocation2 + $0x170] ss:$8 sps:$4 sm:$0xff]  }
  0x23   :  { %v1401_v51 = vld [vmem:[#allocation2 + $0x180] ss:$8 sps:$4 sm:$0xff]   ;;  %v1403_v52 = vld [vmem:[#allocation2 + $0x184] ss:$8 sps:$4 sm:$0xff]   ;;  %v1406_v53 = vld [vmem:[#allocation2 + $0x194] ss:$8 sps:$4 sm:$0xff]  }
  0x24   :  { %148 = vmatpush1.bf16.msra.mxu0 %v1343_v13  ;;  %395 = vmatpush1.bf16.msra.mxu1 %v1364_v22  ;;  %v1404_v54 = vld [vmem:[#allocation2 + $0x190] ss:$8 sps:$4 sm:$0xff]   ;;  %v1409_v55 = vld [vmem:[#allocation2 + $0x1a4] ss:$8 sps:$4 sm:$0xff]   ;;  %v1407_v56 = vld [vmem:[#allocation2 + $0x1a0] ss:$8 sps:$4 sm:$0xff]  }
  0x25   :  { %149 = vmatprep.subr.bf16.mxu0 %v1344_v16  ;;  %396 = vmatprep.subr.bf16.mxu1 %v1365_v23  ;;  %v1412_v57 = vld [vmem:[#allocation2 + $0x1b4] ss:$8 sps:$4 sm:$0xff]   ;;  %v1410_v58 = vld [vmem:[#allocation2 + $0x1b0] ss:$8 sps:$4 sm:$0xff]   ;;  %v1415_v59 = vld [vmem:[#allocation2 + $0x1c4] ss:$8 sps:$4 sm:$0xff]  }
  0x26   :  { %v1413_v60 = vld [vmem:[#allocation2 + $0x1c0] ss:$8 sps:$4 sm:$0xff]   ;;  %v1418_v61 = vld [vmem:[#allocation2 + $0x1d4] ss:$8 sps:$4 sm:$0xff]   ;;  %v1416_v62 = vld [vmem:[#allocation2 + $0x1d0] ss:$8 sps:$4 sm:$0xff]  }
  0x27   :  { %v1421_v63 = vld [vmem:[#allocation2 + $0x1e4] ss:$8 sps:$4 sm:$0xff]   ;;  %v1419_v0 = vld [vmem:[#allocation2 + $0x1e0] ss:$8 sps:$4 sm:$0xff]   ;;  %v1424_v1 = vld [vmem:[#allocation2 + $0x1f4] ss:$8 sps:$4 sm:$0xff]  }
  0x28   :  { %150 = vmatpush1.bf16.msra.mxu0 %v1346_v17  ;;  %397 = vmatpush1.bf16.msra.mxu1 %v1367_v27  ;;  %v1422_v2 = vld [vmem:[#allocation2 + $0x1f0] ss:$8 sps:$4 sm:$0xff]   ;;  %v1427_v3 = vld [vmem:[#allocation2 + $0x204] ss:$8 sps:$4 sm:$0xff]   ;;  %v1425_v4 = vld [vmem:[#allocation2 + $0x200] ss:$8 sps:$4 sm:$0xff]  }
  0x29   :  { %151 = vmatprep.subr.bf16.mxu0 %v1347_v20  ;;  %398 = vmatprep.subr.bf16.mxu1 %v1368_v28  ;;  %v1430_v5 = vld [vmem:[#allocation2 + $0x214] ss:$8 sps:$4 sm:$0xff]   ;;  %v1428_v6 = vld [vmem:[#allocation2 + $0x210] ss:$8 sps:$4 sm:$0xff]   ;;  %v1433_v7 = vld [vmem:[#allocation2 + $0x224] ss:$8 sps:$4 sm:$0xff]  }
  0x2a   :  { %v1431_v8 = vld [vmem:[#allocation2 + $0x220] ss:$8 sps:$4 sm:$0xff]   ;;  %v1436_v9 = vld [vmem:[#allocation2 + $0x234] ss:$8 sps:$4 sm:$0xff]   ;;  %v1434_v10 = vld [vmem:[#allocation2 + $0x230] ss:$8 sps:$4 sm:$0xff]  }
  0x2b   :  { %v1439_v11 = vld [vmem:[#allocation2 + $0x244] ss:$8 sps:$4 sm:$0xff]   ;;  %v1437_v12 = vld [vmem:[#allocation2 + $0x240] ss:$8 sps:$4 sm:$0xff]   ;;  %v1442_v13 = vld [vmem:[#allocation2 + $0x254] ss:$8 sps:$4 sm:$0xff]  }
  0x2c   :  { %152 = vmatpush1.bf16.msra.mxu0 %v1349_v21  ;;  %399 = vmatpush1.bf16.msra.mxu1 %v1370_v29  ;;  %v1440_v14 = vld [vmem:[#allocation2 + $0x250] ss:$8 sps:$4 sm:$0xff]   ;;  %v50_v16 = vshrl.u32 %v49_v15, 7  ;;  %v46_v18 = vld [vmem:[%s1645_s2] sm:$0x3] }
  0x2d   :  { %153 = vmatprep.subr.bf16.mxu0 %v1350_v24  ;;  %400 = vmatprep.subr.bf16.mxu1 %v1371_v30  ;;  %v1496_v15 = vld [vmem:[#allocation2 + $0x374] ss:$8 sps:$4 sm:$0xff]  }
  0x2e   :  { %v1612_v17 = vsub.s32 0, %v50_v16  ;;  %v1617_v19 = vsub.s32 1, %v50_v16  ;;  %v1494_v16 = vld [vmem:[#allocation2 + $0x370] ss:$8 sps:$4 sm:$0xff]  }
  0x30   :  { %154 = vmatpush1.bf16.msra.mxu0 %v1352_v25  ;;  %401 = vmatpush1.bf16.msra.mxu1 %v1373_v32  ;;  %v52_v20 = vrot.slane %v46_v18, %v1612_v17  ;;  %v56_v21 = vrot.slane %v46_v18, %v1617_v19  ;;  %v1445_v32 = vld [vmem:[#allocation2 + $0x264] ss:$8 sps:$4 sm:$0xff]   ;;  %v1497_v18 = vld [vmem:[#allocation2 + $0x380] ss:$8 sps:$4 sm:$0xff]  }
  0x31   :  { %402 = vmatprep.subr.bf16.mxu1 %v1374_v33  ;;  %637 = vmatprep.subr.bf16.mxu0 %v1403_v52  ;;  %v1443_v33 = vld [vmem:[#allocation2 + $0x260] ss:$8 sps:$4 sm:$0xff]   ;;  %v1475_v52 = vld [vmem:[#allocation2 + $0x304] ss:$8 sps:$4 sm:$0xff]  }
  0x33   :  { %172 = vmatmul.mubr.bf16.vlgmr.msra.gmra.mrb[0].mxu0 %v47_v31 }
  0x34   :  { %403 = vmatpush1.bf16.msra.mxu1 %v1376_v34  ;;  %638 = vmatpush1.bf16.msra.mxu0 %v1401_v51  ;;  %v1448_v34 = vld [vmem:[#allocation2 + $0x274] ss:$8 sps:$4 sm:$0xff]   ;;  %v1470_v51 = vld [vmem:[#allocation2 + $0x2f0] ss:$8 sps:$4 sm:$0xff]  }
  0x35   :  { %404 = vmatprep.subr.bf16.mxu1 %v1377_v35  ;;  %639 = vmatprep.subr.bf16.mxu0 %v1406_v53  ;;  %v1446_v35 = vld [vmem:[#allocation2 + $0x270] ss:$8 sps:$4 sm:$0xff]   ;;  %v1473_v53 = vld [vmem:[#allocation2 + $0x300] ss:$8 sps:$4 sm:$0xff]  }
  0x38   :  { %405 = vmatpush1.bf16.msra.mxu1 %v1379_v36  ;;  %640 = vmatpush1.bf16.msra.mxu0 %v1404_v54  ;;  %v1449_v36 = vld [vmem:[#allocation2 + $0x280] ss:$8 sps:$4 sm:$0xff]   ;;  %v1478_v54 = vld [vmem:[#allocation2 + $0x314] ss:$8 sps:$4 sm:$0xff]  }
  0x39   :  { %406 = vmatprep.subr.bf16.mxu1 %v1380_v37  ;;  %641 = vmatprep.subr.bf16.mxu0 %v1409_v55  ;;  %v1451_v37 = vld [vmem:[#allocation2 + $0x284] ss:$8 sps:$4 sm:$0xff]   ;;  %v1476_v55 = vld [vmem:[#allocation2 + $0x310] ss:$8 sps:$4 sm:$0xff]  }
  0x3c   :  { %407 = vmatpush1.bf16.msra.mxu1 %v1382_v38  ;;  %642 = vmatpush1.bf16.msra.mxu0 %v1407_v56  ;;  %v1454_v38 = vld [vmem:[#allocation2 + $0x294] ss:$8 sps:$4 sm:$0xff]   ;;  %v1481_v56 = vld [vmem:[#allocation2 + $0x324] ss:$8 sps:$4 sm:$0xff]  }
  0x3d   :  { %408 = vmatprep.subr.bf16.mxu1 %v1383_v39  ;;  %643 = vmatprep.subr.bf16.mxu0 %v1412_v57  ;;  %v1452_v39 = vld [vmem:[#allocation2 + $0x290] ss:$8 sps:$4 sm:$0xff]   ;;  %v1479_v57 = vld [vmem:[#allocation2 + $0x320] ss:$8 sps:$4 sm:$0xff]  }
  0x40   :  { %409 = vmatpush1.bf16.msra.mxu1 %v1385_v40  ;;  %644 = vmatpush1.bf16.msra.mxu0 %v1410_v58  ;;  %v1457_v40 = vld [vmem:[#allocation2 + $0x2a4] ss:$8 sps:$4 sm:$0xff]   ;;  %v1484_v58 = vld [vmem:[#allocation2 + $0x334] ss:$8 sps:$4 sm:$0xff]  }
  0x41   :  { %410 = vmatprep.subr.bf16.mxu1 %v1386_v41  ;;  %645 = vmatprep.subr.bf16.mxu0 %v1415_v59  ;;  %v1455_v41 = vld [vmem:[#allocation2 + $0x2a0] ss:$8 sps:$4 sm:$0xff]   ;;  %v1482_v59 = vld [vmem:[#allocation2 + $0x330] ss:$8 sps:$4 sm:$0xff]  }
  0x44   :  { %411 = vmatpush1.bf16.msra.mxu1 %v1388_v42  ;;  %646 = vmatpush1.bf16.msra.mxu0 %v1413_v60  ;;  %v1460_v42 = vld [vmem:[#allocation2 + $0x2b4] ss:$8 sps:$4 sm:$0xff]   ;;  %v1487_v60 = vld [vmem:[#allocation2 + $0x344] ss:$8 sps:$4 sm:$0xff]  }
  0x45   :  { %412 = vmatprep.subr.bf16.mxu1 %v1389_v43  ;;  %647 = vmatprep.subr.bf16.mxu0 %v1418_v61  ;;  %v1458_v43 = vld [vmem:[#allocation2 + $0x2b0] ss:$8 sps:$4 sm:$0xff]   ;;  %v1485_v61 = vld [vmem:[#allocation2 + $0x340] ss:$8 sps:$4 sm:$0xff]  }
  0x48   :  { %413 = vmatpush1.bf16.msra.mxu1 %v1391_v44  ;;  %648 = vmatpush1.bf16.msra.mxu0 %v1416_v62  ;;  %v1463_v44 = vld [vmem:[#allocation2 + $0x2c4] ss:$8 sps:$4 sm:$0xff]   ;;  %v1490_v62 = vld [vmem:[#allocation2 + $0x354] ss:$8 sps:$4 sm:$0xff]  }
  0x49   :  { %414 = vmatprep.subr.bf16.mxu1 %v1392_v45  ;;  %649 = vmatprep.subr.bf16.mxu0 %v1421_v63  ;;  %v1461_v45 = vld [vmem:[#allocation2 + $0x2c0] ss:$8 sps:$4 sm:$0xff]   ;;  %v1488_v63 = vld [vmem:[#allocation2 + $0x350] ss:$8 sps:$4 sm:$0xff]  }
  0x4c   :  { %415 = vmatpush1.bf16.msra.mxu1 %v1394_v46  ;;  %650 = vmatpush1.bf16.msra.mxu0 %v1419_v0  ;;  %v1466_v46 = vld [vmem:[#allocation2 + $0x2d4] ss:$8 sps:$4 sm:$0xff]   ;;  %v214_v0 = vld [vmem:[%s1645_s2 + $0x2] sm:$0x3] }
  0x4d   :  { %416 = vmatprep.subr.bf16.mxu1 %v1395_v47  ;;  %651 = vmatprep.subr.bf16.mxu0 %v1424_v1  ;;  %v1464_v47 = vld [vmem:[#allocation2 + $0x2d0] ss:$8 sps:$4 sm:$0xff]   ;;  %v221_v1 = vrot.slane %v214_v0, %v1612_v17 }
  0x50   :  { %417 = vmatpush1.bf16.msra.mxu1 %v1397_v48  ;;  %652 = vmatpush1.bf16.msra.mxu0 %v1422_v2  ;;  %v1469_v48 = vld [vmem:[#allocation2 + $0x2e4] ss:$8 sps:$4 sm:$0xff]   ;;  %v225_v2 = vrot.slane %v214_v0, %v1617_v19 }
  0x51   :  { %418 = vmatprep.subr.bf16.mxu1 %v1398_v49  ;;  %653 = vmatprep.subr.bf16.mxu0 %v1427_v3  ;;  %v1467_v49 = vld [vmem:[#allocation2 + $0x2e0] ss:$8 sps:$4 sm:$0xff]   ;;  %v712_v0 = vld [vmem:[%s1645_s2 + $0x6] sm:$0x3] }
  0x54   :  { %419 = vmatpush1.bf16.msra.mxu1 %v1400_v50  ;;  %654 = vmatpush1.bf16.msra.mxu0 %v1425_v4  ;;  %v1472_v50 = vld [vmem:[#allocation2 + $0x2f4] ss:$8 sps:$4 sm:$0xff]  }
  0x55   :  { %655 = vmatprep.subr.bf16.mxu0 %v1430_v5  ;;  %886 = vmatprep.subr.bf16.mxu1 %v1451_v37  ;;  %v1526_v37 = vld [vmem:[#allocation2 + $0x414] ss:$8 sps:$4 sm:$0xff]  }
  0x58   :  { %656 = vmatpush1.bf16.msra.mxu0 %v1428_v6 }
  0x59   :  { %657 = vmatprep.subr.bf16.mxu0 %v1433_v7 }
  0x5c   :  { %658 = vmatpush1.bf16.msra.mxu0 %v1431_v8 }
  0x5d   :  { %659 = vmatprep.subr.bf16.mxu0 %v1436_v9 }
  0x60   :  { %660 = vmatpush1.bf16.msra.mxu0 %v1434_v10 }
  0x61   :  { %661 = vmatprep.subr.bf16.mxu0 %v1439_v11 }
  0x64   :  { %662 = vmatpush1.bf16.msra.mxu0 %v1437_v12 }
  0x65   :  { %663 = vmatprep.subr.bf16.mxu0 %v1442_v13  ;;  %v1493_v13 = vld [vmem:[#allocation2 + $0x364] ss:$8 sps:$4 sm:$0xff]  }
  0x68   :  { %664 = vmatpush1.bf16.msra.mxu0 %v1440_v14  ;;  %v1491_v14 = vld [vmem:[#allocation2 + $0x360] ss:$8 sps:$4 sm:$0xff]  }
  0x69   :  { %665 = vmatprep.subr.bf16.mxu0 %v1445_v32  ;;  %v1515_v32 = vld [vmem:[#allocation2 + $0x3e0] ss:$8 sps:$4 sm:$0xff]  }
  0x6c   :  { %666 = vmatpush1.bf16.msra.mxu0 %v1443_v33  ;;  %v1520_v33 = vld [vmem:[#allocation2 + $0x3f4] ss:$8 sps:$4 sm:$0xff]  }
  0x6d   :  { %667 = vmatprep.subr.bf16.mxu0 %v1448_v34  ;;  %v1518_v34 = vld [vmem:[#allocation2 + $0x3f0] ss:$8 sps:$4 sm:$0xff]  }
  0x70   :  { %668 = vmatpush1.bf16.msra.mxu0 %v1446_v35  ;;  %v1523_v35 = vld [vmem:[#allocation2 + $0x404] ss:$8 sps:$4 sm:$0xff]  }
 0x106   :  { %v173_v22 = vpop.f32.mrb[0].mxu0 }
 0x107   :  { %v174_v23 = vadd.f32 %v173_v22, %v52_v20  ;;  %v175_v24 = vpop.f32.mrb[1].mxu0  ;;  %v1499_v20 = vld [vmem:[#allocation2 + $0x384] ss:$8 sps:$4 sm:$0xff]   ;;  %v1500_v22 = vld [vmem:[#allocation2 + $0x390] ss:$8 sps:$4 sm:$0xff]  }
 0x108   :  { %v176_v25 = vadd.f32 %v175_v24, %v56_v21  ;;  %v177_v26 = vpop.f32.mrb[2].mxu0  ;;  %v1502_v21 = vld [vmem:[#allocation2 + $0x394] ss:$8 sps:$4 sm:$0xff]   ;;  %1130 = vmatprep.subr.bf16.mxu0 %v1499_v20  ;;  %v1503_v24 = vld [vmem:[#allocation2 + $0x3a0] ss:$8 sps:$4 sm:$0xff]  }
 0x109   :  { %v180_v27 = vmax.f32 %v174_v23, 0.0  ;;  %v178_v28 = vpop.f32.mrb[3].mxu0  ;;  %v1505_v23 = vld [vmem:[#allocation2 + $0x3a4] ss:$8 sps:$4 sm:$0xff]   ;;  %v1506_v26 = vld [vmem:[#allocation2 + $0x3b0] ss:$8 sps:$4 sm:$0xff]  }
 0x10a   :  { %v181_v29 = vmax.f32 %v176_v25, 0.0  ;;  %v1508_v25 = vld [vmem:[#allocation2 + $0x3b4] ss:$8 sps:$4 sm:$0xff]   ;;  %v1509_v28 = vld [vmem:[#allocation2 + $0x3c0] ss:$8 sps:$4 sm:$0xff]  }
 0x10b   :  { %v215_v31 = vpack.c.bf16 %v180_v27, %v180_v27  ;;  %v1511_v27 = vld [vmem:[#allocation2 + $0x3c4] ss:$8 sps:$4 sm:$0xff]  }
 0x10c   :  { %v216_v30 = vpack.c.bf16 %v181_v29, %v181_v29  ;;  %v1514_v29 = vld [vmem:[#allocation2 + $0x3d4] ss:$8 sps:$4 sm:$0xff]  }
 0x10e   :  { %420 = vmatprep.mubr.bf16.mxu1 %v216_v30  ;;  %v1512_v30 = vld [vmem:[#allocation2 + $0x3d0] ss:$8 sps:$4 sm:$0xff]  }
 0x10f   :  { %421 = vmatmul.mubr.bf16.vlgmr.msra.gmra.mrb[0].mxu1 %v215_v31  ;;  %v1517_v31 = vld [vmem:[#allocation2 + $0x3e4] ss:$8 sps:$4 sm:$0xff]  }
 0x110   :  { %887 = vmatpush1.bf16.msra.mxu1 %v1449_v36  ;;  %v1521_v36 = vld [vmem:[#allocation2 + $0x400] ss:$8 sps:$4 sm:$0xff]  }
 0x111   :  { %888 = vmatprep.subr.bf16.mxu1 %v1454_v38  ;;  %v1524_v38 = vld [vmem:[#allocation2 + $0x410] ss:$8 sps:$4 sm:$0xff]  }
 0x114   :  { %889 = vmatpush1.bf16.msra.mxu1 %v1452_v39  ;;  %v1529_v39 = vld [vmem:[#allocation2 + $0x424] ss:$8 sps:$4 sm:$0xff]  }
 0x115   :  { %890 = vmatprep.subr.bf16.mxu1 %v1457_v40  ;;  %v1527_v40 = vld [vmem:[#allocation2 + $0x420] ss:$8 sps:$4 sm:$0xff]  }
 0x118   :  { %891 = vmatpush1.bf16.msra.mxu1 %v1455_v41  ;;  %v1532_v41 = vld [vmem:[#allocation2 + $0x434] ss:$8 sps:$4 sm:$0xff]  }
 0x119   :  { %892 = vmatprep.subr.bf16.mxu1 %v1460_v42  ;;  %v1530_v42 = vld [vmem:[#allocation2 + $0x430] ss:$8 sps:$4 sm:$0xff]  }
 0x11c   :  { %893 = vmatpush1.bf16.msra.mxu1 %v1458_v43  ;;  %v1535_v43 = vld [vmem:[#allocation2 + $0x444] ss:$8 sps:$4 sm:$0xff]  }
 0x11d   :  { %894 = vmatprep.subr.bf16.mxu1 %v1463_v44  ;;  %v1533_v44 = vld [vmem:[#allocation2 + $0x440] ss:$8 sps:$4 sm:$0xff]  }
 0x120   :  { %895 = vmatpush1.bf16.msra.mxu1 %v1461_v45  ;;  %v1538_v45 = vld [vmem:[#allocation2 + $0x454] ss:$8 sps:$4 sm:$0xff]  }
 0x121   :  { %896 = vmatprep.subr.bf16.mxu1 %v1466_v46  ;;  %v1536_v46 = vld [vmem:[#allocation2 + $0x450] ss:$8 sps:$4 sm:$0xff]  }
 0x124   :  { %897 = vmatpush1.bf16.msra.mxu1 %v1464_v47  ;;  %v463_v47 = vld [vmem:[%s1645_s2 + $0x4] sm:$0x3] }
 0x125   :  { %898 = vmatprep.subr.bf16.mxu1 %v1469_v48  ;;  %v470_v48 = vrot.slane %v463_v47, %v1612_v17 }
 0x128   :  { %899 = vmatpush1.bf16.msra.mxu1 %v1467_v49  ;;  %v474_v49 = vrot.slane %v463_v47, %v1617_v19 }
 0x129   :  { %900 = vmatprep.subr.bf16.mxu1 %v1472_v50 }
 0x12c   :  { %901 = vmatpush1.bf16.msra.mxu1 %v1470_v51 }
 0x12d   :  { %902 = vmatprep.subr.bf16.mxu1 %v1475_v52 }
 0x130   :  { %903 = vmatpush1.bf16.msra.mxu1 %v1473_v53 }
 0x131   :  { %904 = vmatprep.subr.bf16.mxu1 %v1478_v54 }
 0x134   :  { %905 = vmatpush1.bf16.msra.mxu1 %v1476_v55 }
 0x135   :  { %906 = vmatprep.subr.bf16.mxu1 %v1481_v56 }
 0x138   :  { %907 = vmatpush1.bf16.msra.mxu1 %v1479_v57 }
 0x139   :  { %908 = vmatprep.subr.bf16.mxu1 %v1484_v58 }
 0x13c   :  { %909 = vmatpush1.bf16.msra.mxu1 %v1482_v59 }
 0x13d   :  { %910 = vmatprep.subr.bf16.mxu1 %v1487_v60  ;;  %v1541_v60 = vld [vmem:[#allocation2 + $0x464] ss:$8 sps:$4 sm:$0xff]  }
 0x140   :  { %911 = vmatpush1.bf16.msra.mxu1 %v1485_v61  ;;  %v1539_v61 = vld [vmem:[#allocation2 + $0x460] ss:$8 sps:$4 sm:$0xff]  }
 0x141   :  { %912 = vmatprep.subr.bf16.mxu1 %v1490_v62  ;;  %v1544_v62 = vld [vmem:[#allocation2 + $0x474] ss:$8 sps:$4 sm:$0xff]  }
 0x144   :  { %913 = vmatpush1.bf16.msra.mxu1 %v1488_v63  ;;  %v1542_v63 = vld [vmem:[#allocation2 + $0x470] ss:$8 sps:$4 sm:$0xff]  }
 0x145   :  { %914 = vmatprep.subr.bf16.mxu1 %v1493_v13  ;;  %v961_v13 = vld [vmem:[%s1645_s2 + $0x8] sm:$0x3] }
 0x148   :  { %915 = vmatpush1.bf16.msra.mxu1 %v1491_v14  ;;  %v968_v14 = vrot.slane %v961_v13, %v1612_v17 }
 0x149   :  { %916 = vmatprep.subr.bf16.mxu1 %v1496_v15 }
 0x14c   :  { %917 = vmatpush1.bf16.msra.mxu1 %v1494_v16 }
 0x1e2   :  { %v422_v3 = vpop.f32.mrb[0].mxu1 }
 0x1e3   :  { %v423_v4 = vadd.f32 %v422_v3, %v221_v1  ;;  %v424_v5 = vpop.f32.mrb[1].mxu1  ;;  %v719_v1 = vrot.slane %v712_v0, %v1612_v17 }
 0x1e4   :  { %v425_v6 = vadd.f32 %v424_v5, %v225_v2  ;;  %v426_v7 = vpop.f32.mrb[2].mxu1  ;;  %v723_v2 = vrot.slane %v712_v0, %v1617_v19 }
 0x1e5   :  { %v429_v8 = vmax.f32 %v423_v4, 0.0  ;;  %v427_v9 = vpop.f32.mrb[3].mxu1 }
 0x1e6   :  { %v430_v10 = vmax.f32 %v425_v6, 0.0 }
 0x1e7   :  { %v464_v12 = vpack.c.bf16 %v429_v8, %v429_v8 }
 0x1e8   :  { %v465_v11 = vpack.c.bf16 %v430_v10, %v430_v10 }
 0x1ea   :  { %669 = vmatprep.mubr.bf16.mxu0 %v465_v11 }
 0x1eb   :  { %670 = vmatmul.mubr.bf16.vlgmr.msra.gmra.mrb[4].mxu0 %v464_v12 }
 0x1ec   :  { %1131 = vmatpush1.bf16.msra.mxu0 %v1497_v18 }
 0x1ed   :  { %1132 = vmatprep.subr.bf16.mxu0 %v1502_v21 }
 0x1f0   :  { %1133 = vmatpush1.bf16.msra.mxu0 %v1500_v22 }
 0x1f1   :  { %1134 = vmatprep.subr.bf16.mxu0 %v1505_v23 }
 0x1f4   :  { %1135 = vmatpush1.bf16.msra.mxu0 %v1503_v24 }
 0x1f5   :  { %1136 = vmatprep.subr.bf16.mxu0 %v1508_v25 }
 0x1f8   :  { %1137 = vmatpush1.bf16.msra.mxu0 %v1506_v26 }
 0x1f9   :  { %1138 = vmatprep.subr.bf16.mxu0 %v1511_v27 }
 0x1fc   :  { %1139 = vmatpush1.bf16.msra.mxu0 %v1509_v28 }
 0x1fd   :  { %1140 = vmatprep.subr.bf16.mxu0 %v1514_v29 }
 0x200   :  { %1141 = vmatpush1.bf16.msra.mxu0 %v1512_v30 }
 0x201   :  { %1142 = vmatprep.subr.bf16.mxu0 %v1517_v31 }
 0x204   :  { %1143 = vmatpush1.bf16.msra.mxu0 %v1515_v32 }
 0x205   :  { %1144 = vmatprep.subr.bf16.mxu0 %v1520_v33 }
 0x208   :  { %1145 = vmatpush1.bf16.msra.mxu0 %v1518_v34 }
 0x209   :  { %1146 = vmatprep.subr.bf16.mxu0 %v1523_v35 }
 0x20c   :  { %1147 = vmatpush1.bf16.msra.mxu0 %v1521_v36 }
 0x20d   :  { %1148 = vmatprep.subr.bf16.mxu0 %v1526_v37 }
 0x210   :  { %1149 = vmatpush1.bf16.msra.mxu0 %v1524_v38 }
 0x211   :  { %1150 = vmatprep.subr.bf16.mxu0 %v1529_v39 }
 0x214   :  { %1151 = vmatpush1.bf16.msra.mxu0 %v1527_v40 }
 0x215   :  { %1152 = vmatprep.subr.bf16.mxu0 %v1532_v41 }
 0x218   :  { %1153 = vmatpush1.bf16.msra.mxu0 %v1530_v42 }
 0x219   :  { %1154 = vmatprep.subr.bf16.mxu0 %v1535_v43 }
 0x21c   :  { %1155 = vmatpush1.bf16.msra.mxu0 %v1533_v44 }
 0x21d   :  { %1156 = vmatprep.subr.bf16.mxu0 %v1538_v45 }
 0x220   :  { %1157 = vmatpush1.bf16.msra.mxu0 %v1536_v46 }
 0x221   :  { %1158 = vmatprep.subr.bf16.mxu0 %v1541_v60 }
 0x224   :  { %1159 = vmatpush1.bf16.msra.mxu0 %v1539_v61 }
 0x225   :  { %1160 = vmatprep.subr.bf16.mxu0 %v1544_v62 }
 0x228   :  { %1161 = vmatpush1.bf16.msra.mxu0 %v1542_v63 }
 0x2be   :  { %v671_v50 = vpop.f32.mrb[4].mxu0 }
 0x2bf   :  { %v672_v51 = vadd.f32 %v671_v50, %v470_v48  ;;  %v673_v52 = vpop.f32.mrb[5].mxu0 }
 0x2c0   :  { %v674_v53 = vadd.f32 %v673_v52, %v474_v49  ;;  %v675_v54 = vpop.f32.mrb[6].mxu0 }
 0x2c1   :  { %v678_v55 = vmax.f32 %v672_v51, 0.0  ;;  %v676_v56 = vpop.f32.mrb[7].mxu0 }
 0x2c2   :  { %v679_v57 = vmax.f32 %v674_v53, 0.0 }
 0x2c3   :  { %v713_v59 = vpack.c.bf16 %v678_v55, %v678_v55 }
 0x2c4   :  { %v714_v58 = vpack.c.bf16 %v679_v57, %v679_v57 }
 0x2c6   :  { %918 = vmatprep.mubr.bf16.mxu1 %v714_v58 }
 0x2c7   :  { %919 = vmatmul.mubr.bf16.vlgmr.msra.gmra.mrb[4].mxu1 %v713_v59 }
 0x39a   :  { %v920_v3 = vpop.f32.mrb[4].mxu1 }
 0x39b   :  { %v921_v4 = vadd.f32 %v920_v3, %v719_v1  ;;  %v922_v5 = vpop.f32.mrb[5].mxu1 }
 0x39c   :  { %v923_v6 = vadd.f32 %v922_v5, %v723_v2  ;;  %v924_v7 = vpop.f32.mrb[6].mxu1 }
 0x39d   :  { %v927_v8 = vmax.f32 %v921_v4, 0.0  ;;  %v925_v9 = vpop.f32.mrb[7].mxu1 }
 0x39e   :  { %v928_v10 = vmax.f32 %v923_v6, 0.0 }
 0x39f   :  { %v962_v12 = vpack.c.bf16 %v927_v8, %v927_v8 }
 0x3a0   :  { %v963_v11 = vpack.c.bf16 %v928_v10, %v928_v10 }
 0x3a2   :  { %1162 = vmatprep.mubr.bf16.mxu0 %v963_v11 }
 0x3a3   :  { %1163 = vmatmul.mubr.bf16.vlgmr.msra.gmra.mrb[8].mxu0 %v962_v12 }
 0x476   :  { %v1164_v15 = vpop.f32.mrb[8].mxu0 }
 0x477   :  { %v1165_v19 = vadd.f32 %v1164_v15, %v968_v14  ;;  %v1166_v16 = vpop.f32.mrb[9].mxu0 }
 0x478   :  { %v1167_v18 = vpop.f32.mrb[10].mxu0 }
 0x479   :  { %v1170_v20 = vsub.f32 0.0, %v1165_v19  ;;  %v1168_v21 = vpop.f32.mrb[11].mxu0 }
 0x47b   :  { %v1171_v22 = vmul.f32 1.442695, %v1170_v20 }
 0x47d   :  { %1545 = vpow2.f32 %v1171_v22 }
 0x487   :  { %v1546_v23 = vpop.eup %1545 }
 0x488   :  { %v1173_v24 = vadd.f32 1.0, %v1546_v23 }
 0x48a   :  { %1547 = vrcp.f32 %v1173_v24 }
 0x494   :  { %v1548_v25 = vpop.eup %1547 }
 0x495   :  { %1175 = vst [vmem:[%s1646_s3] sm:$0xff] %v1548_v25 }
 0x496   :  { %1180 = vsyncpa [#allocation3], 1 }

</bundles_post_ra>
